<compile_context>
chip_gen: v7x
topology: tpu7x:2x2x1
jax: 0.10.0
libtpu: 0.0.40
codegen_flags: <defaults>
</compile_context>

<pallas_src>
import functools

import jax
import jax.numpy as jnp
import numpy as np
from jax import lax
from jax.experimental import pallas as pl
from jax.experimental.pallas import tpu as pltpu


# ----------------------------------------------------------------------------
# Kernel: fused linear + (optional) L2 normalization along the feature axis
# ----------------------------------------------------------------------------
def _projecter_kernel(x_ref, w_ref, b_ref, o_ref, *, norm, eps):
    # x_ref: (TB, Din)  w_ref: (Din, Dout)  b_ref: (1, Dout)  o_ref: (TB, Dout)
    y = jnp.dot(x_ref[...], w_ref[...], preferred_element_type=jnp.float32)
    y = y + b_ref[...].astype(jnp.float32)
    if norm:  # static Python branch (norm is a trace-time constant)
        sq = jnp.sum(y * y, axis=-1, keepdims=True)              # (TB, 1)
        # sqrt(max(sq, eps^2)) == max(sqrt(sq), eps)  -> exact F.normalize
        inv = lax.rsqrt(jnp.maximum(sq, eps * eps))               # EUP, (TB, 1)
        y = y * inv                                               # one VPU mul
    o_ref[...] = y.astype(o_ref.dtype)


def _round_up(v, m):
    return ((v + m - 1) // m) * m


def projecter_forward(
    x,
    w,
    b,
    *,
    norm=True,
    eps=1e-12,
    tile_b=512,
    compute_dtype=jnp.bfloat16,
    out_dtype=None,
):
    """x: (B, Din), w: (Din, Dout) [= torch weight.T], b: (Dout,) or (1, Dout).

    Equivalent to `F.normalize(nn.Linear(Din, Dout)(x), dim=1)` when norm=True.
    """
    B, Din = x.shape
    Dout = w.shape[1]
    out_dtype = x.dtype if out_dtype is None else out_dtype

    b = jnp.asarray(b).reshape(1, Dout)

    # Lane-dense output: pad Dout up to a multiple of 128 so stores are
    # unmasked `vst` (zero columns contribute 0 to the row norm).  In a real
    # model the weights would be pre-padded once at load time, not per call.
    Dout_pad = max(128, _round_up(Dout, 128))
    if Dout_pad != Dout:
        w = jnp.pad(w, ((0, 0), (0, Dout_pad - Dout)))
        b = jnp.pad(b, ((0, 0), (0, Dout_pad - Dout)))

    # bf16 (by default) operands for the MXU and halved HBM read traffic;
    # accumulation stays f32 inside the kernel.  Bias stays f32 (tiny).
    x_c = x.astype(compute_dtype)
    w_c = w.astype(compute_dtype)
    b_c = b.astype(jnp.float32)

    # Batch tile: multiple of 8 sublanes, capped by the (8-rounded) batch.
    # No host-side padding of x: Pallas masks the partial last block.
    tb = min(_round_up(max(tile_b, 8), 8), _round_up(B, 8))
    grid = (pl.cdiv(B, tb),)

    # Explicit VMEM budget: resident weight + bias + double-buffered x/out
    # tiles, with headroom; clipped to stay within v7x's 64 MiB physical VMEM.
    csize = np.dtype(compute_dtype).itemsize
    osize = np.dtype(out_dtype).itemsize
    est = (
        Din * Dout_pad * csize          # weight (single-buffered, resident)
        + 2 * Dout_pad * 4              # bias
        + 2 * tb * Din * csize          # x tile, double-buffered
        + 2 * tb * Dout_pad * osize     # out tile, double-buffered
    )
    vmem_limit = int(min(max(4 * est, 32 * 1024 * 1024), 64 * 1024 * 1024))

    kernel = functools.partial(_projecter_kernel, norm=norm, eps=float(eps))

    def _call(weight_buffer_count):
        # Weight/bias block index never changes across the grid -> single
        # buffering avoids the 2x resident footprint of default pipelining.
        resident_kwargs = (
            {} if weight_buffer_count is None
            else dict(pipeline_mode=pl.Buffered(weight_buffer_count))
        )
        out = pl.pallas_call(
            kernel,
            grid=grid,
            in_specs=[
                pl.BlockSpec((tb, Din), lambda i: (i, 0)),                       # x tile
                pl.BlockSpec((Din, Dout_pad), lambda i: (0, 0), **resident_kwargs),  # weight
                pl.BlockSpec((1, Dout_pad), lambda i: (0, 0), **resident_kwargs),    # bias
            ],
            out_specs=pl.BlockSpec((tb, Dout_pad), lambda i: (i, 0)),
            out_shape=jax.ShapeDtypeStruct((B, Dout_pad), out_dtype),
            compiler_params=pltpu.CompilerParams(
                dimension_semantics=("parallel",),   # shards batch over v7x's 2 TCs
                vmem_limit_bytes=vmem_limit,
            ),
        )(x_c, w_c, b_c)
        return jax.block_until_ready(out)

    try:
        out = _call(1)        # single-buffer the never-refetched weight/bias
    except Exception:
        out = _call(None)     # fallback: default double-buffering

    return out[:, :Dout] if Dout_pad != Dout else out


# ----------------------------------------------------------------------------
# Pure-JAX reference (for correctness checks)
# ----------------------------------------------------------------------------
def reference_forward(x, w, b, *, norm=True, eps=1e-12, compute_dtype=None):
    if compute_dtype is not None:
        y = jnp.dot(
            x.astype(compute_dtype),
            w.astype(compute_dtype),
            preferred_element_type=jnp.float32,
        )
    else:
        y = jnp.dot(x, w, preferred_element_type=jnp.float32)
    y = y + jnp.asarray(b).reshape(1, -1).astype(jnp.float32)
    if norm:
        denom = jnp.maximum(jnp.sqrt(jnp.sum(y * y, axis=1, keepdims=True)), eps)
        y = y / denom
    return y.astype(x.dtype)


if __name__ == "__main__":
    # Small shapes consistent with the module: a projection head over a batch
    # of feature vectors.  output_dim=128 keeps the main path lane-dense.
    B, input_dim, output_dim = 8, 32, 128

    key = jax.random.PRNGKey(0)
    kx, kw, kb = jax.random.split(key, 3)
    x = jax.random.normal(kx, (B, input_dim), dtype=jnp.float32)
    # w is (Din, Dout) == torch Linear.weight.T (pre-transposed at load time).
    w = 0.1 * jax.random.normal(kw, (input_dim, output_dim), dtype=jnp.float32)
    b = 0.1 * jax.random.normal(kb, (1, output_dim), dtype=jnp.float32)

    # norm=True path (bf16 MXU operands, f32 accumulation)
    out = jax.block_until_ready(projecter_forward(x, w, b, norm=True))
    ref = reference_forward(x, w, b, norm=True, compute_dtype=jnp.bfloat16)
    assert out.shape == (B, output_dim), out.shape
    np.testing.assert_allclose(np.asarray(out), np.asarray(ref), rtol=5e-3, atol=5e-3)

    # norm=False path, full f32 compute
    out2 = projecter_forward(x, w, b, norm=False, compute_dtype=jnp.float32)
    ref2 = reference_forward(x, w, b, norm=False)
    np.testing.assert_allclose(np.asarray(out2), np.asarray(ref2), rtol=5e-3, atol=5e-3)

    # Partial last batch block (B not a multiple of 8) — no host-side pad copy.
    out3 = projecter_forward(x[:5], w, b, norm=True)
    ref3 = reference_forward(x[:5], w, b, norm=True, compute_dtype=jnp.bfloat16)
    np.testing.assert_allclose(np.asarray(out3), np.asarray(ref3), rtol=5e-3, atol=5e-3)

    # Non-lane-dense Dout (96) — wrapper pads to 128 and slices back.
    out4 = projecter_forward(x, w[:, :96], b[:, :96], norm=True)
    ref4 = reference_forward(x, w[:, :96], b[:, :96], norm=True, compute_dtype=jnp.bfloat16)
    assert out4.shape == (B, 96), out4.shape
    np.testing.assert_allclose(np.asarray(out4), np.asarray(ref4), rtol=5e-3, atol=5e-3)

    print("KERNEL_OK")
</pallas_src>

<mosaic_0001>
module attributes {stable_mosaic.version = 11 : i64} {
  func.func @_projecter_kernel(%arg0: i32, %arg1: memref<8x32xbf16, #tpu.memory_space<vmem>>, %arg2: memref<32x128xbf16, #tpu.memory_space<vmem>>, %arg3: memref<1x128xf32, #tpu.memory_space<vmem>>, %arg4: memref<8x128xf32, #tpu.memory_space<vmem>>) attributes {dimension_semantics = [#tpu.dimension_semantics<parallel>], iteration_bounds = array<i64: 1>, scalar_prefetch = 0 : i64, scratch_operands = 0 : i64, tpu.core_type = #tpu.core_type<tc>, window_params = [{transform_indices = @transform_0, window_bounds = array<i64: 8, 32>}, {pipeline_mode = #tpu.pipeline_mode<synchronous>, transform_indices = @transform_1, window_bounds = array<i64: 32, 128>}, {pipeline_mode = #tpu.pipeline_mode<synchronous>, transform_indices = @transform_2, window_bounds = array<i64: 1, 128>}, {transform_indices = @transform_3, window_bounds = array<i64: 8, 128>}]} {
    %c0 = arith.constant 0 : index
    %c0_0 = arith.constant 0 : index
    %0 = vector.load %arg1[%c0, %c0_0] : memref<8x32xbf16, #tpu.memory_space<vmem>>, vector<8x32xbf16>
    %c0_1 = arith.constant 0 : index
    %c0_2 = arith.constant 0 : index
    %1 = vector.load %arg2[%c0_1, %c0_2] : memref<32x128xbf16, #tpu.memory_space<vmem>>, vector<32x128xbf16>
    %cst = arith.constant dense<0.000000e+00> : vector<8x128xf32>
    %2 = tpu.matmul %0, %1, %cst {dimension_numbers = #tpu.dot_dimension_numbers<[1], [0], [0], [1], [0, 0, 1, 1], [], []>} : vector<8x32xbf16>, vector<32x128xbf16>, vector<8x128xf32> -> vector<8x128xf32>
    %c0_3 = arith.constant 0 : index
    %c0_4 = arith.constant 0 : index
    %3 = vector.load %arg3[%c0_3, %c0_4] : memref<1x128xf32, #tpu.memory_space<vmem>>, vector<1x128xf32>
    %4 = vector.broadcast %3 : vector<1x128xf32> to vector<8x128xf32>
    %5 = arith.addf %2, %4 : vector<8x128xf32>
    %6 = arith.mulf %5, %5 : vector<8x128xf32>
    %cst_5 = arith.constant dense<0.000000e+00> : vector<8xf32>
    %7 = vector.multi_reduction <add>, %6, %cst_5 [1] : vector<8x128xf32> to vector<8xf32>
    %8 = vector.shape_cast %7 : vector<8xf32> to vector<8x1xf32>
    %cst_6 = arith.constant 1.000000e-24 : f32
    %9 = vector.broadcast %cst_6 : f32 to vector<8x1xf32>
    %10 = arith.maximumf %8, %9 : vector<8x1xf32>
    %11 = math.rsqrt %10 : vector<8x1xf32>
    %12 = vector.broadcast %11 : vector<8x1xf32> to vector<8x128xf32>
    %13 = arith.mulf %5, %12 : vector<8x128xf32>
    %c0_7 = arith.constant 0 : index
    %c0_8 = arith.constant 0 : index
    %14 = vector.load %arg4[%c0_7, %c0_8] : memref<8x128xf32, #tpu.memory_space<vmem>>, vector<8x128xf32>
    tpu.vector_store %arg4[%c0_7, %c0_8], %13 {strides = array<i32>} : memref<8x128xf32, #tpu.memory_space<vmem>>, vector<8x128xf32>,
    return
  }
  func.func @transform_0(%arg0: i32) -> (i32, i32) {
    %c0_i32 = arith.constant 0 : i32
    %c0_i32_0 = arith.constant 0 : i32
    return %arg0, %c0_i32 : i32, i32
  }
  func.func @transform_1(%arg0: i32) -> (i32, i32) {
    %c0_i32 = arith.constant 0 : i32
    %c0_i32_0 = arith.constant 0 : i32
    %c0_i32_1 = arith.constant 0 : i32
    return %c0_i32, %c0_i32_0 : i32, i32
  }
  func.func @transform_2(%arg0: i32) -> (i32, i32) {
    %c0_i32 = arith.constant 0 : i32
    %c0_i32_0 = arith.constant 0 : i32
    %c0_i32_1 = arith.constant 0 : i32
    return %c0_i32, %c0_i32_0 : i32, i32
  }
  func.func @transform_3(%arg0: i32) -> (i32, i32) {
    %c0_i32 = arith.constant 0 : i32
    %c0_i32_0 = arith.constant 0 : i32
    return %arg0, %c0_i32 : i32, i32
  }
}

module attributes {stable_mosaic.version = 11 : i64} {
  func.func @_projecter_kernel(%arg0: i32, %arg1: memref<8x32xbf16, #tpu.memory_space<vmem>>, %arg2: memref<32x128xbf16, #tpu.memory_space<vmem>>, %arg3: memref<1x128xf32, #tpu.memory_space<vmem>>, %arg4: memref<8x128xf32, #tpu.memory_space<vmem>>) attributes {dimension_semantics = [#tpu.dimension_semantics<parallel>], iteration_bounds = array<i64: 1>, scalar_prefetch = 0 : i64, scratch_operands = 0 : i64, tpu.core_type = #tpu.core_type<tc>, window_params = [{transform_indices = @transform_0, window_bounds = array<i64: 8, 32>}, {pipeline_mode = #tpu.pipeline_mode<synchronous>, transform_indices = @transform_1, window_bounds = array<i64: 32, 128>}, {pipeline_mode = #tpu.pipeline_mode<synchronous>, transform_indices = @transform_2, window_bounds = array<i64: 1, 128>}, {transform_indices = @transform_3, window_bounds = array<i64: 8, 128>}]} {
    %c0 = arith.constant 0 : index
    %c0_0 = arith.constant 0 : index
    %0 = vector.load %arg1[%c0, %c0_0] : memref<8x32xbf16, #tpu.memory_space<vmem>>, vector<8x32xbf16>
    %c0_1 = arith.constant 0 : index
    %c0_2 = arith.constant 0 : index
    %1 = vector.load %arg2[%c0_1, %c0_2] : memref<32x128xbf16, #tpu.memory_space<vmem>>, vector<32x128xbf16>
    %cst = arith.constant dense<0.000000e+00> : vector<8x128xf32>
    %2 = tpu.matmul %0, %1, %cst {dimension_numbers = #tpu.dot_dimension_numbers<[1], [0], [0], [1], [0, 0, 1, 1], [], []>} : vector<8x32xbf16>, vector<32x128xbf16>, vector<8x128xf32> -> vector<8x128xf32>
    %c0_3 = arith.constant 0 : index
    %c0_4 = arith.constant 0 : index
    %3 = vector.load %arg3[%c0_3, %c0_4] : memref<1x128xf32, #tpu.memory_space<vmem>>, vector<1x128xf32>
    %4 = vector.broadcast %3 : vector<1x128xf32> to vector<8x128xf32>
    %5 = arith.addf %2, %4 : vector<8x128xf32>
    %6 = arith.mulf %5, %5 : vector<8x128xf32>
    %cst_5 = arith.constant dense<0.000000e+00> : vector<8xf32>
    %7 = vector.multi_reduction <add>, %6, %cst_5 [1] : vector<8x128xf32> to vector<8xf32>
    %8 = vector.shape_cast %7 : vector<8xf32> to vector<8x1xf32>
    %cst_6 = arith.constant 1.000000e-24 : f32
    %9 = vector.broadcast %cst_6 : f32 to vector<8x1xf32>
    %10 = arith.maximumf %8, %9 : vector<8x1xf32>
    %11 = math.rsqrt %10 : vector<8x1xf32>
    %12 = vector.broadcast %11 : vector<8x1xf32> to vector<8x128xf32>
    %13 = arith.mulf %5, %12 : vector<8x128xf32>
    %c0_7 = arith.constant 0 : index
    %c0_8 = arith.constant 0 : index
    %14 = vector.load %arg4[%c0_7, %c0_8] : memref<8x128xf32, #tpu.memory_space<vmem>>, vector<8x128xf32>
    tpu.vector_store %arg4[%c0_7, %c0_8], %13 {strides = array<i32>} : memref<8x128xf32, #tpu.memory_space<vmem>>, vector<8x128xf32>,
    return
  }
  func.func @transform_0(%arg0: i32) -> (i32, i32) {
    %c0_i32 = arith.constant 0 : i32
    %c0_i32_0 = arith.constant 0 : i32
    return %arg0, %c0_i32 : i32, i32
  }
  func.func @transform_1(%arg0: i32) -> (i32, i32) {
    %c0_i32 = arith.constant 0 : i32
    %c0_i32_0 = arith.constant 0 : i32
    %c0_i32_1 = arith.constant 0 : i32
    return %c0_i32, %c0_i32_0 : i32, i32
  }
  func.func @transform_2(%arg0: i32) -> (i32, i32) {
    %c0_i32 = arith.constant 0 : i32
    %c0_i32_0 = arith.constant 0 : i32
    %c0_i32_1 = arith.constant 0 : i32
    return %c0_i32, %c0_i32_0 : i32, i32
  }
  func.func @transform_3(%arg0: i32) -> (i32, i32) {
    %c0_i32 = arith.constant 0 : i32
    %c0_i32_0 = arith.constant 0 : i32
    return %arg0, %c0_i32 : i32, i32
  }
}

</mosaic_0001>

<bundles_post_ra>
// kernel: tpu_custom_call.1
= control target key start
LH: loop header
LB: loop body
LE: loop exit
PB: predicated region body
PF: predicated region fallthrough
CT: control target
= control target key end

     0   :  { %8 = vsyncpa [#allocation3], 0  ;;  %s304_s0 = inlined_call_operand.hbm [shape: bf16[8,32], index: 0, kind: input, shape index: {}]   ;;  %s305_s1 = inlined_call_operand.hbm [shape: bf16[32,128], index: 1, kind: input, shape index: {}]   ;;  %s306_s2 = inlined_call_operand.vmem [shape: f32[1,128], index: 2, kind: input, shape index: {}]   ;;  %s307_s3 = inlined_call_operand.hbm [shape: f32[8,128], index: 3, kind: output, shape index: {}]  }
   0x1   :  { %9 = vsyncpa [#allocation6], 0 }
   0x2   :  { %10 = vsyncpa [#allocation4], 0  ;;  %s231_s12 = smov [#allocation2]   ;;  %s232_s14 = smov [#allocation5]  }
   0x3   :  { %s17_s13 = sshll.u32 %s231_s12, 4  ;;  %s26_s15 = sshll.u32 %s232_s14, 4  ;;  %s18_s13 = int_to_ptr.vmem [resolvable:$true] %s17_s13  ;;  %s258_s15 = int_to_ptr.vmem [resolvable:$true] %s26_s15 }
   0x4   :  { %s159_s18 = scalar_lea.hbm %s304_s0, 64 }
   0x5   :  { %p160_p0 = scmp.ne.s32.totalorder %s304_s0, %s159_s18  ;;  %p163_p1 = scmp.lt.u32.totalorder %s159_s18, %s304_s0 }
   0x7   :  { %p165_p2 = pnand %p163_p1, %p160_p0 }
   0x9   :  { %168 = shalt.err (!%p165_p2)
}
   0xa   :  { %s169_s23 = scalar_lea.vmem %s18_s13, 64  ;;  %p174_p4 = scmp.lt.s32.totalorder %s18_s13, %s18_s13 }
   0xb   :  { %p170_p3 = scmp.ne.s32.totalorder %s18_s13, %s169_s23  ;;  %p175_p5 = scmp.lt.s32.totalorder %s169_s23, %s169_s23 }
   0xd   :  { %p176_p6 = por %p175_p5, %p174_p4 }
   0xf   :  { %p177_p7 = pnand %p176_p6, %p170_p3 }
  0x11   :  { %180 = shalt.err (!%p177_p7)
}
  0x12   :  { %20 = dma.hbm_to_vmem [thread:$0]  %s304_s0, 64, %s18_s13, [#allocation3]  }
  0x13   :  { %s181_s28 = scalar_lea.hbm %s305_s1, 256 }
  0x14   :  { %p182_p8 = scmp.ne.s32.totalorder %s305_s1, %s181_s28  ;;  %p185_p9 = scmp.lt.u32.totalorder %s181_s28, %s305_s1 }
  0x16   :  { %p187_p10 = pnand %p185_p9, %p182_p8 }
  0x18   :  { %190 = shalt.err (!%p187_p10)
}
  0x19   :  { %s191_s6 = scalar_lea.vmem %s258_s15, 256  ;;  %p196_p12 = scmp.lt.s32.totalorder %s258_s15, %s258_s15 }
  0x1a   :  { %p192_p11 = scmp.ne.s32.totalorder %s258_s15, %s191_s6  ;;  %p197_p13 = scmp.lt.s32.totalorder %s191_s6, %s191_s6 }
  0x1c   :  { %p198_p0 = por %p197_p13, %p196_p12 }
  0x1e   :  { %p199_p1 = pnand %p198_p0, %p192_p11 }
  0x20   :  { %202 = shalt.err (!%p199_p1)
}
  0x21   :  { %s233_s0 = smov 64   ;;  %s234_s7 = smov 4  }
  0x22   :  { %32 = dma.hbm_to_vmem [thread:$0]  %s305_s1, 256, %s258_s15, [#allocation6], %s233_s0, %s233_s0, %s234_s7  }
  0x23   :  { %225 = dma.done.wait [#allocation3], 64  }
  0x24   :  { %226 = vsyncadd [#allocation3], 4294967232 }
  0x25   :  { %227 = dma.done.wait [#allocation6], 256  }
  0x26   :  { %228 = vsyncadd [#allocation6], 4294967040  ;;  %v235_v0 = vmov 0.0   ;;  %vm236_vm0 = vmmov 0   ;;  %v155_v1 = vld [vmem:[#allocation5] sm:$0xff]   ;;  %v156_v2 = vld [vmem:[#allocation5 + $0x8] sm:$0xff]  }
  0x27   :  { %140 = vmatprep.subr.bf16.mxu0 %v235_v0  ;;  %144 = vmatprep.mubr.msk.bf16.mxu0 %vm236_vm0, %v235_v0  ;;  %v42_v3 = vld [vmem:[#allocation2] sm:$0xf]  ;;  %vm66_vm1 = vcmask 261120   ;;  %s237_s1 = smov [#allocation7]  }
  0x28   :  { %141 = vmatpush3.bf16.msra.mxu0 %v155_v1  ;;  %v133_v4 = vld [vmem:[%s306_s2] ss:$0 sm:$0xff]  ;;  %s123_s12 = sshll.u32 %s237_s1, 4  ;;  %s124_s12 = int_to_ptr.vmem [resolvable:$true] %s123_s12 }
  0x29   :  { %142 = vmatprep.subr.bf16.mxu0 %v235_v0  ;;  %s203_s13 = scalar_lea.vmem %s124_s12, 128  ;;  %p208_p3 = scmp.lt.s32.totalorder %s124_s12, %s124_s12 }
  0x2a   :  { %p204_p2 = scmp.ne.s32.totalorder %s124_s12, %s203_s13  ;;  %p209_p4 = scmp.lt.s32.totalorder %s203_s13, %s203_s13 }
  0x2c   :  { %143 = vmatpush3.bf16.msra.mxu0 %v156_v2  ;;  %p210_p5 = por %p209_p4, %p208_p3 }
  0x2e   :  { %p211_p6 = pnand %p210_p5, %p204_p2 }
  0x2f   :  { %145 = vmatmul.mubr.msk.bf16.vlgmr.msra.gmra.mrb[0].mxu0 %vm66_vm1, %v42_v3 }
 0x102   :  { %v104_v5 = vpop.f32.mrb[0].mxu0 }
 0x103   :  { %v105_v6 = vadd.f32 %v133_v4, %v104_v5  ;;  %v146_v7 = vpop.f32.mrb[1].mxu0 }
 0x104   :  { %v107_v8 = vpop.f32.mrb[2].mxu0 }
 0x105   :  { %v147_v9 = vpop.f32.mrb[3].mxu0  ;;  %v110_v10 = vmul.f32 %v105_v6, %v105_v6 }
 0x107   :  { %111 = vadd.xlane.f32.xlu0 %v110_v10 }
 0x194   :  { %v112_v11 = vpop.xlane.xlu0 %111 }
 0x195   :  { %v113_v12 = vmax.f32 %v112_v11, 1e-24 }
 0x197   :  { %157 = vrsqrt.f32 %v113_v12 }
 0x1a1   :  { %v158_v13 = vpop.eup %157 }
 0x1a2   :  { %v115_v14 = vmul.f32 %v158_v13, %v105_v6 }
 0x1a4   :  { %116 = vst [vmem:[#allocation7] sm:$0xff] %v115_v14 }
 0x1a5   :  { %214 = shalt.err (!%p211_p6)
}
 0x1a6   :  { %s215_s15 = scalar_lea.hbm %s307_s3, 128 }
 0x1a7   :  { %p216_p7 = scmp.ne.s32.totalorder %s307_s3, %s215_s15  ;;  %p219_p8 = scmp.lt.u32.totalorder %s215_s15, %s307_s3 }
 0x1a9   :  { %p221_p9 = pnand %p219_p8, %p216_p7 }
 0x1ab   :  { %224 = shalt.err (!%p221_p9)
}
 0x1ac   :  { %126 = dma.vmem_to_hbm [thread:$0]  %s124_s12, 128, %s307_s3, [#allocation4]  }
 0x1ad   :  { %229 = dma.done.wait [#allocation4], 128  }
 0x1ae   :  { %230 = vsyncadd [#allocation4], 4294967168 }
 0x1af   :  { %130 = vsyncpa [#allocation3], 1 }
 0x1b0   :  { %131 = vsyncpa [#allocation6], 1 }
 0x1b1   :  { %132 = vsyncpa [#allocation4], 1 }

// kernel: tpu_custom_call.1
= control target key start
LH: loop header
LB: loop body
LE: loop exit
PB: predicated region body
PF: predicated region fallthrough
CT: control target
= control target key end

     0   :  { %8 = vsyncpa [#allocation3], 0  ;;  %s304_s0 = inlined_call_operand.hbm [shape: bf16[8,32], index: 0, kind: input, shape index: {}]   ;;  %s305_s1 = inlined_call_operand.hbm [shape: bf16[32,128], index: 1, kind: input, shape index: {}]   ;;  %s306_s2 = inlined_call_operand.vmem [shape: f32[1,128], index: 2, kind: input, shape index: {}]   ;;  %s307_s3 = inlined_call_operand.hbm [shape: f32[8,128], index: 3, kind: output, shape index: {}]  }
   0x1   :  { %9 = vsyncpa [#allocation6], 0 }
   0x2   :  { %10 = vsyncpa [#allocation4], 0  ;;  %s231_s12 = smov [#allocation2]   ;;  %s232_s14 = smov [#allocation5]  }
   0x3   :  { %s17_s13 = sshll.u32 %s231_s12, 4  ;;  %s26_s15 = sshll.u32 %s232_s14, 4  ;;  %s18_s13 = int_to_ptr.vmem [resolvable:$true] %s17_s13  ;;  %s258_s15 = int_to_ptr.vmem [resolvable:$true] %s26_s15 }
   0x4   :  { %s159_s18 = scalar_lea.hbm %s304_s0, 64 }
   0x5   :  { %p160_p0 = scmp.ne.s32.totalorder %s304_s0, %s159_s18  ;;  %p163_p1 = scmp.lt.u32.totalorder %s159_s18, %s304_s0 }
   0x7   :  { %p165_p2 = pnand %p163_p1, %p160_p0 }
   0x9   :  { %168 = shalt.err (!%p165_p2)
}
   0xa   :  { %s169_s23 = scalar_lea.vmem %s18_s13, 64  ;;  %p174_p4 = scmp.lt.s32.totalorder %s18_s13, %s18_s13 }
   0xb   :  { %p170_p3 = scmp.ne.s32.totalorder %s18_s13, %s169_s23  ;;  %p175_p5 = scmp.lt.s32.totalorder %s169_s23, %s169_s23 }
   0xd   :  { %p176_p6 = por %p175_p5, %p174_p4 }
   0xf   :  { %p177_p7 = pnand %p176_p6, %p170_p3 }
  0x11   :  { %180 = shalt.err (!%p177_p7)
}
  0x12   :  { %20 = dma.hbm_to_vmem [thread:$0]  %s304_s0, 64, %s18_s13, [#allocation3]  }
  0x13   :  { %s181_s28 = scalar_lea.hbm %s305_s1, 256 }
  0x14   :  { %p182_p8 = scmp.ne.s32.totalorder %s305_s1, %s181_s28  ;;  %p185_p9 = scmp.lt.u32.totalorder %s181_s28, %s305_s1 }
  0x16   :  { %p187_p10 = pnand %p185_p9, %p182_p8 }
  0x18   :  { %190 = shalt.err (!%p187_p10)
}
  0x19   :  { %s191_s6 = scalar_lea.vmem %s258_s15, 256  ;;  %p196_p12 = scmp.lt.s32.totalorder %s258_s15, %s258_s15 }
  0x1a   :  { %p192_p11 = scmp.ne.s32.totalorder %s258_s15, %s191_s6  ;;  %p197_p13 = scmp.lt.s32.totalorder %s191_s6, %s191_s6 }
  0x1c   :  { %p198_p0 = por %p197_p13, %p196_p12 }
  0x1e   :  { %p199_p1 = pnand %p198_p0, %p192_p11 }
  0x20   :  { %202 = shalt.err (!%p199_p1)
}
  0x21   :  { %s233_s0 = smov 64   ;;  %s234_s7 = smov 4  }
  0x22   :  { %32 = dma.hbm_to_vmem [thread:$0]  %s305_s1, 256, %s258_s15, [#allocation6], %s233_s0, %s233_s0, %s234_s7  }
  0x23   :  { %225 = dma.done.wait [#allocation3], 64  }
  0x24   :  { %226 = vsyncadd [#allocation3], 4294967232 }
  0x25   :  { %227 = dma.done.wait [#allocation6], 256  }
  0x26   :  { %228 = vsyncadd [#allocation6], 4294967040  ;;  %v235_v0 = vmov 0.0   ;;  %vm236_vm0 = vmmov 0   ;;  %v155_v1 = vld [vmem:[#allocation5] sm:$0xff]   ;;  %v156_v2 = vld [vmem:[#allocation5 + $0x8] sm:$0xff]  }
  0x27   :  { %140 = vmatprep.subr.bf16.mxu0 %v235_v0  ;;  %144 = vmatprep.mubr.msk.bf16.mxu0 %vm236_vm0, %v235_v0  ;;  %v42_v3 = vld [vmem:[#allocation2] sm:$0xf]  ;;  %vm66_vm1 = vcmask 261120   ;;  %s237_s1 = smov [#allocation7]  }
  0x28   :  { %141 = vmatpush3.bf16.msra.mxu0 %v155_v1  ;;  %v133_v4 = vld [vmem:[%s306_s2] ss:$0 sm:$0xff]  ;;  %s123_s12 = sshll.u32 %s237_s1, 4  ;;  %s124_s12 = int_to_ptr.vmem [resolvable:$true] %s123_s12 }
  0x29   :  { %142 = vmatprep.subr.bf16.mxu0 %v235_v0  ;;  %s203_s13 = scalar_lea.vmem %s124_s12, 128  ;;  %p208_p3 = scmp.lt.s32.totalorder %s124_s12, %s124_s12 }
  0x2a   :  { %p204_p2 = scmp.ne.s32.totalorder %s124_s12, %s203_s13  ;;  %p209_p4 = scmp.lt.s32.totalorder %s203_s13, %s203_s13 }
  0x2c   :  { %143 = vmatpush3.bf16.msra.mxu0 %v156_v2  ;;  %p210_p5 = por %p209_p4, %p208_p3 }
  0x2e   :  { %p211_p6 = pnand %p210_p5, %p204_p2 }
  0x2f   :  { %145 = vmatmul.mubr.msk.bf16.vlgmr.msra.gmra.mrb[0].mxu0 %vm66_vm1, %v42_v3 }
 0x102   :  { %v104_v5 = vpop.f32.mrb[0].mxu0 }
 0x103   :  { %v105_v6 = vadd.f32 %v133_v4, %v104_v5  ;;  %v146_v7 = vpop.f32.mrb[1].mxu0 }
 0x104   :  { %v107_v8 = vpop.f32.mrb[2].mxu0 }
 0x105   :  { %v147_v9 = vpop.f32.mrb[3].mxu0  ;;  %v110_v10 = vmul.f32 %v105_v6, %v105_v6 }
 0x107   :  { %111 = vadd.xlane.f32.xlu0 %v110_v10 }
 0x194   :  { %v112_v11 = vpop.xlane.xlu0 %111 }
 0x195   :  { %v113_v12 = vmax.f32 %v112_v11, 1e-24 }
 0x197   :  { %157 = vrsqrt.f32 %v113_v12 }
 0x1a1   :  { %v158_v13 = vpop.eup %157 }
 0x1a2   :  { %v115_v14 = vmul.f32 %v158_v13, %v105_v6 }
 0x1a4   :  { %116 = vst [vmem:[#allocation7] sm:$0xff] %v115_v14 }
 0x1a5   :  { %214 = shalt.err (!%p211_p6)
}
 0x1a6   :  { %s215_s15 = scalar_lea.hbm %s307_s3, 128 }
 0x1a7   :  { %p216_p7 = scmp.ne.s32.totalorder %s307_s3, %s215_s15  ;;  %p219_p8 = scmp.lt.u32.totalorder %s215_s15, %s307_s3 }
 0x1a9   :  { %p221_p9 = pnand %p219_p8, %p216_p7 }
 0x1ab   :  { %224 = shalt.err (!%p221_p9)
}
 0x1ac   :  { %126 = dma.vmem_to_hbm [thread:$0]  %s124_s12, 128, %s307_s3, [#allocation4]  }
 0x1ad   :  { %229 = dma.done.wait [#allocation4], 128  }
 0x1ae   :  { %230 = vsyncadd [#allocation4], 4294967168 }
 0x1af   :  { %130 = vsyncpa [#allocation3], 1 }
 0x1b0   :  { %131 = vsyncpa [#allocation6], 1 }
 0x1b1   :  { %132 = vsyncpa [#allocation4], 1 }

</bundles_post_ra>
